<compile_context>
chip_gen: v7x
topology: tpu7x:2x2x1
jax: 0.10.0
libtpu: 0.0.40
codegen_flags: <defaults>
</compile_context>

<pallas_src>
import jax
import jax.numpy as jnp
from jax.experimental import pallas as pl
from jax.experimental.pallas import tpu as pltpu

# Logical sizes (PyTorch module) and padded, lane-aligned sizes.
IN_F, H1, H2, OUT_F = 248, 120, 84, 2
IN_P, H1_P, H2_P, OUT_P = 256, 128, 128, 128
W_ROWS = IN_P + H1_P + H2_P        # 512 rows in the fused weight slab
MAX_TB = 256                       # batch tile (rows per grid step)


def _round_up(x, m):
    return ((x + m - 1) // m) * m


def mlp_kernel(x_ref, w_ref, b_ref, o_ref):
    # x tile is already bf16; weights are bf16; accumulate in f32 on the MXU.
    x = x_ref[...]

    w1 = w_ref[0:IN_P, :]                      # (256, 128)  static, 8-aligned slices
    w2 = w_ref[IN_P:IN_P + H1_P, :]            # (128, 128)
    w3 = w_ref[IN_P + H1_P:W_ROWS, :]          # (128, 128)

    # fc1 + ReLU
    h1 = jnp.dot(x, w1, preferred_element_type=jnp.float32)
    h1 = jnp.maximum(h1 + b_ref[0:1, :], 0.0)
    # fc2 + ReLU
    h2 = jnp.dot(h1.astype(jnp.bfloat16), w2, preferred_element_type=jnp.float32)
    h2 = jnp.maximum(h2 + b_ref[1:2, :], 0.0)
    # fc3 (no activation); padded output lanes 2..127 are exactly zero.
    h3 = jnp.dot(h2.astype(jnp.bfloat16), w3, preferred_element_type=jnp.float32)
    o_ref[...] = (h3 + b_ref[2:3, :]).astype(o_ref.dtype)


def init_params(key, l1=H1, l2=H2, in_features=IN_F, out_features=OUT_F):
    """nn.Linear-style U(-1/sqrt(fan_in), 1/sqrt(fan_in)) init.
    Weights stored transposed as (in, out); biases as (1, out). All f32."""
    keys = jax.random.split(key, 6)

    def lin(kw, kb, fan_in, fan_out):
        bound = 1.0 / jnp.sqrt(jnp.float32(fan_in))
        w = jax.random.uniform(kw, (fan_in, fan_out), jnp.float32, -bound, bound)
        b = jax.random.uniform(kb, (1, fan_out), jnp.float32, -bound, bound)
        return w, b

    w1, b1 = lin(keys[0], keys[1], in_features, l1)
    w2, b2 = lin(keys[2], keys[3], l1, l2)
    w3, b3 = lin(keys[4], keys[5], l2, out_features)
    return (w1, b1, w2, b2, w3, b3)


def pack_params(params):
    """Zero-pad each layer to lane-aligned sizes and fuse into two slabs:
       w_slab: (512, 128) bf16   [rows 0:256 = W1, 256:384 = W2, 384:512 = W3]
       b_slab: (8, 128)   f32    [row 0 = b1, row 1 = b2, row 2 = b3]"""
    w1, b1, w2, b2, w3, b3 = params

    def pad2(a, rows, cols):
        return jnp.pad(a, ((0, rows - a.shape[0]), (0, cols - a.shape[1])))

    w_slab = jnp.concatenate(
        [pad2(w1, IN_P, H1_P), pad2(w2, H1_P, H2_P), pad2(w3, H2_P, OUT_P)],
        axis=0).astype(jnp.bfloat16)

    b_slab = jnp.zeros((8, OUT_P), jnp.float32)
    b_slab = b_slab.at[0, :H1].set(b1[0])
    b_slab = b_slab.at[1, :H2].set(b2[0])
    b_slab = b_slab.at[2, :OUT_F].set(b3[0])
    return w_slab, b_slab


def neural_net_forward(x, packed):
    """x: (B, ...) whose trailing dims flatten to 248. Returns (B, 2) f32."""
    w_slab, b_slab = packed
    B = x.shape[0]
    x2d = x.reshape(B, -1).astype(jnp.float32)
    assert x2d.shape[1] == IN_F, x2d.shape

    # Choose the batch tile: multiple of 8, capped at MAX_TB; pad B to a
    # multiple of the tile so the last grid step is never partial.
    b8 = _round_up(B, 8)
    tb = b8 if b8 <= MAX_TB else MAX_TB
    b_pad = _round_up(B, tb)

    xp = jnp.pad(x2d, ((0, b_pad - B), (0, IN_P - IN_F))).astype(jnp.bfloat16)

    out = pl.pallas_call(
        mlp_kernel,
        out_shape=jax.ShapeDtypeStruct((b_pad, OUT_P), jnp.float32),
        grid_spec=pltpu.PrefetchScalarGridSpec(
            num_scalar_prefetch=0,
            grid=(b_pad // tb,),
            in_specs=[
                pl.BlockSpec((tb, IN_P), lambda i: (i, 0)),        # streamed x tile
                pl.BlockSpec((W_ROWS, OUT_P), lambda i: (0, 0)),   # resident weights
                pl.BlockSpec((8, OUT_P), lambda i: (0, 0)),        # resident biases
            ],
            out_specs=pl.BlockSpec((tb, OUT_P), lambda i: (i, 0)),
        ),
        compiler_params=pltpu.CompilerParams(
            dimension_semantics=("parallel",)),
    )(xp, w_slab, b_slab)

    return out[:B, :OUT_F]


def reference_forward(x, params):
    """Pure-JAX reference emulating the kernel's bf16-in / f32-accum matmuls."""
    w1, b1, w2, b2, w3, b3 = params
    bf = jnp.bfloat16
    x2d = x.reshape(x.shape[0], -1).astype(jnp.float32)
    h1 = jnp.maximum(
        jnp.dot(x2d.astype(bf), w1.astype(bf), preferred_element_type=jnp.float32) + b1, 0.0)
    h2 = jnp.maximum(
        jnp.dot(h1.astype(bf), w2.astype(bf), preferred_element_type=jnp.float32) + b2, 0.0)
    return jnp.dot(h2.astype(bf), w3.astype(bf), preferred_element_type=jnp.float32) + b3


if __name__ == "__main__":
    key = jax.random.PRNGKey(0)
    k_params, k_x = jax.random.split(key)

    params = init_params(k_params)
    packed = pack_params(params)

    # Small batch, 248 input features (x.view(B,-1) is a no-op reshape here).
    B = 8
    x = jax.random.normal(k_x, (B, IN_F), dtype=jnp.float32)

    out = neural_net_forward(x, packed)
    out = jax.block_until_ready(out)

    ref = reference_forward(x, params)
    assert out.shape == (B, 2), out.shape
    assert jnp.allclose(out, ref, atol=2e-2, rtol=2e-2), "mismatch vs JAX reference"

    print("KERNEL_OK")
</pallas_src>

<mosaic_0001>
module attributes {stable_mosaic.version = 11 : i64} {
  func.func @mlp_kernel(%arg0: i32, %arg1: memref<8x256xbf16, #tpu.memory_space<vmem>>, %arg2: memref<512x128xbf16, #tpu.memory_space<vmem>>, %arg3: memref<8x128xf32, #tpu.memory_space<vmem>>, %arg4: memref<8x128xf32, #tpu.memory_space<vmem>>) attributes {dimension_semantics = [#tpu.dimension_semantics<parallel>], iteration_bounds = array<i64: 1>, scalar_prefetch = 0 : i64, scratch_operands = 0 : i64, tpu.core_type = #tpu.core_type<tc>, window_params = [{transform_indices = @transform_0, window_bounds = array<i64: 8, 256>}, {pipeline_mode = #tpu.pipeline_mode<synchronous>, transform_indices = @transform_1, window_bounds = array<i64: 512, 128>}, {pipeline_mode = #tpu.pipeline_mode<synchronous>, transform_indices = @transform_2, window_bounds = array<i64: 8, 128>}, {transform_indices = @transform_3, window_bounds = array<i64: 8, 128>}]} {
    %c0 = arith.constant 0 : index
    %c0_0 = arith.constant 0 : index
    %0 = vector.load %arg1[%c0, %c0_0] : memref<8x256xbf16, #tpu.memory_space<vmem>>, vector<8x256xbf16>
    %c0_1 = arith.constant 0 : index
    %c0_2 = arith.constant 0 : index
    %1 = vector.load %arg2[%c0_1, %c0_2] : memref<512x128xbf16, #tpu.memory_space<vmem>>, vector<256x128xbf16>
    %c256 = arith.constant 256 : index
    %c0_3 = arith.constant 0 : index
    %2 = vector.load %arg2[%c256, %c0_3] : memref<512x128xbf16, #tpu.memory_space<vmem>>, vector<128x128xbf16>
    %c384 = arith.constant 384 : index
    %c0_4 = arith.constant 0 : index
    %3 = vector.load %arg2[%c384, %c0_4] : memref<512x128xbf16, #tpu.memory_space<vmem>>, vector<128x128xbf16>
    %cst = arith.constant dense<0.000000e+00> : vector<8x128xf32>
    %4 = tpu.matmul %0, %1, %cst {dimension_numbers = #tpu.dot_dimension_numbers<[1], [0], [0], [1], [0, 0, 1, 1], [], []>} : vector<8x256xbf16>, vector<256x128xbf16>, vector<8x128xf32> -> vector<8x128xf32>
    %c0_5 = arith.constant 0 : index
    %c0_6 = arith.constant 0 : index
    %5 = vector.load %arg3[%c0_5, %c0_6] : memref<8x128xf32, #tpu.memory_space<vmem>>, vector<1x128xf32>
    %6 = vector.broadcast %5 : vector<1x128xf32> to vector<8x128xf32>
    %7 = arith.addf %4, %6 : vector<8x128xf32>
    %cst_7 = arith.constant 0.000000e+00 : f32
    %8 = vector.broadcast %cst_7 : f32 to vector<8x128xf32>
    %9 = arith.maximumf %7, %8 : vector<8x128xf32>
    %10 = arith.truncf %9 : vector<8x128xf32> to vector<8x128xbf16>
    %cst_8 = arith.constant dense<0.000000e+00> : vector<8x128xf32>
    %11 = tpu.matmul %10, %2, %cst_8 {dimension_numbers = #tpu.dot_dimension_numbers<[1], [0], [0], [1], [0, 0, 1, 1], [], []>} : vector<8x128xbf16>, vector<128x128xbf16>, vector<8x128xf32> -> vector<8x128xf32>
    %c1 = arith.constant 1 : index
    %c0_9 = arith.constant 0 : index
    %12 = vector.load %arg3[%c1, %c0_9] : memref<8x128xf32, #tpu.memory_space<vmem>>, vector<1x128xf32>
    %13 = vector.broadcast %12 : vector<1x128xf32> to vector<8x128xf32>
    %14 = arith.addf %11, %13 : vector<8x128xf32>
    %cst_10 = arith.constant 0.000000e+00 : f32
    %15 = vector.broadcast %cst_10 : f32 to vector<8x128xf32>
    %16 = arith.maximumf %14, %15 : vector<8x128xf32>
    %17 = arith.truncf %16 : vector<8x128xf32> to vector<8x128xbf16>
    %cst_11 = arith.constant dense<0.000000e+00> : vector<8x128xf32>
    %18 = tpu.matmul %17, %3, %cst_11 {dimension_numbers = #tpu.dot_dimension_numbers<[1], [0], [0], [1], [0, 0, 1, 1], [], []>} : vector<8x128xbf16>, vector<128x128xbf16>, vector<8x128xf32> -> vector<8x128xf32>
    %c2 = arith.constant 2 : index
    %c0_12 = arith.constant 0 : index
    %19 = vector.load %arg3[%c2, %c0_12] : memref<8x128xf32, #tpu.memory_space<vmem>>, vector<1x128xf32>
    %20 = vector.broadcast %19 : vector<1x128xf32> to vector<8x128xf32>
    %21 = arith.addf %18, %20 : vector<8x128xf32>
    %c0_13 = arith.constant 0 : index
    %c0_14 = arith.constant 0 : index
    %22 = vector.load %arg4[%c0_13, %c0_14] : memref<8x128xf32, #tpu.memory_space<vmem>>, vector<8x128xf32>
    tpu.vector_store %arg4[%c0_13, %c0_14], %21 {strides = array<i32>} : memref<8x128xf32, #tpu.memory_space<vmem>>, vector<8x128xf32>,
    return
  }
  func.func @transform_0(%arg0: i32) -> (i32, i32) {
    %c0_i32 = arith.constant 0 : i32
    %c0_i32_0 = arith.constant 0 : i32
    return %arg0, %c0_i32 : i32, i32
  }
  func.func @transform_1(%arg0: i32) -> (i32, i32) {
    %c0_i32 = arith.constant 0 : i32
    %c0_i32_0 = arith.constant 0 : i32
    %c0_i32_1 = arith.constant 0 : i32
    return %c0_i32, %c0_i32_0 : i32, i32
  }
  func.func @transform_2(%arg0: i32) -> (i32, i32) {
    %c0_i32 = arith.constant 0 : i32
    %c0_i32_0 = arith.constant 0 : i32
    %c0_i32_1 = arith.constant 0 : i32
    return %c0_i32, %c0_i32_0 : i32, i32
  }
  func.func @transform_3(%arg0: i32) -> (i32, i32) {
    %c0_i32 = arith.constant 0 : i32
    %c0_i32_0 = arith.constant 0 : i32
    return %arg0, %c0_i32 : i32, i32
  }
}

</mosaic_0001>

<bundles_post_ra>
// kernel: tpu_custom_call.1
= control target key start
LH: loop header
LB: loop body
LE: loop exit
PB: predicated region body
PF: predicated region fallthrough
CT: control target
= control target key end

     0   :  { %8 = vsyncpa [#allocation3], 0  ;;  %s820_s0 = inlined_call_operand.hbm [shape: bf16[8,256], index: 0, kind: input, shape index: {}]   ;;  %s821_s1 = inlined_call_operand.hbm [shape: bf16[512,128], index: 1, kind: input, shape index: {}]   ;;  %s822_s2 = inlined_call_operand.hbm [shape: f32[8,128], index: 2, kind: input, shape index: {}]   ;;  %s823_s3 = inlined_call_operand.hbm [shape: f32[8,128], index: 3, kind: output, shape index: {}]  }
   0x1   :  { %9 = vsyncpa [#allocation6], 0 }
   0x2   :  { %10 = vsyncpa [#allocation4], 0  ;;  %s726_s12 = smov [#allocation5]   ;;  %s632_s16 = scalar_lea.hbm %s821_s1, 4096 }
   0x3   :  { %s26_s13 = sshll.u32 %s726_s12, 4  ;;  %p633_p0 = scmp.ne.s32.totalorder %s821_s1, %s632_s16  ;;  %s27_s13 = int_to_ptr.vmem [resolvable:$true] %s26_s13 }
   0x4   :  { %p636_p1 = scmp.lt.u32.totalorder %s632_s16, %s821_s1 }
   0x6   :  { %p638_p2 = pnand %p636_p1, %p633_p0 }
   0x8   :  { %641 = shalt.err (!%p638_p2)
}
   0x9   :  { %s642_s21 = scalar_lea.vmem %s27_s13, 4096  ;;  %p647_p4 = scmp.lt.s32.totalorder %s27_s13, %s27_s13 }
   0xa   :  { %p643_p3 = scmp.ne.s32.totalorder %s27_s13, %s642_s21  ;;  %p648_p5 = scmp.lt.s32.totalorder %s642_s21, %s642_s21 }
   0xc   :  { %p649_p6 = por %p648_p5, %p647_p4 }
   0xe   :  { %p650_p7 = pnand %p649_p6, %p643_p3 }
  0x10   :  { %653 = shalt.err (!%p650_p7)
}
  0x11   :  { %s727_s22 = smov 64   ;;  %s728_s23 = smov 4  }
  0x12   :  { %32 = dma.hbm_to_vmem [thread:$0]  %s821_s1, 4096, %s27_s13, [#allocation6], %s727_s22, %s727_s22, %s728_s23  }
  0x13   :  { %s729_s26 = smov [#allocation2]   ;;  %s730_s28 = smov [#allocation7]  }
  0x14   :  { %s17_s27 = sshll.u32 %s729_s26, 4  ;;  %s39_s29 = sshll.u32 %s730_s28, 4  ;;  %s18_s27 = int_to_ptr.vmem [resolvable:$true] %s17_s27  ;;  %s40_s29 = int_to_ptr.vmem [resolvable:$true] %s39_s29 }
  0x15   :  { %s654_s5 = scalar_lea.hbm %s820_s0, 128 }
  0x16   :  { %p655_p8 = scmp.ne.s32.totalorder %s820_s0, %s654_s5  ;;  %p658_p9 = scmp.lt.u32.totalorder %s654_s5, %s820_s0 }
  0x18   :  { %p660_p10 = pnand %p658_p9, %p655_p8 }
  0x1a   :  { %663 = shalt.err (!%p660_p10)
}
  0x1b   :  { %s664_s1 = scalar_lea.vmem %s18_s27, 128  ;;  %p669_p12 = scmp.lt.s32.totalorder %s18_s27, %s18_s27 }
  0x1c   :  { %p665_p11 = scmp.ne.s32.totalorder %s18_s27, %s664_s1  ;;  %p670_p13 = scmp.lt.s32.totalorder %s664_s1, %s664_s1 }
  0x1e   :  { %p671_p0 = por %p670_p13, %p669_p12 }
  0x20   :  { %p672_p1 = pnand %p671_p0, %p665_p11 }
  0x22   :  { %675 = shalt.err (!%p672_p1)
}
  0x23   :  { %20 = dma.hbm_to_vmem [thread:$0]  %s820_s0, 128, %s18_s27, [#allocation3]  }
  0x24   :  { %s676_s14 = scalar_lea.hbm %s822_s2, 128 }
  0x25   :  { %p677_p2 = scmp.ne.s32.totalorder %s822_s2, %s676_s14  ;;  %p680_p3 = scmp.lt.u32.totalorder %s676_s14, %s822_s2 }
  0x27   :  { %p682_p4 = pnand %p680_p3, %p677_p2 }
  0x29   :  { %685 = shalt.err (!%p682_p4)
}
  0x2a   :  { %s686_s19 = scalar_lea.vmem %s40_s29, 128  ;;  %p691_p6 = scmp.lt.s32.totalorder %s40_s29, %s40_s29 }
  0x2b   :  { %p687_p5 = scmp.ne.s32.totalorder %s40_s29, %s686_s19  ;;  %p692_p7 = scmp.lt.s32.totalorder %s686_s19, %s686_s19 }
  0x2d   :  { %p693_p8 = por %p692_p7, %p691_p6 }
  0x2f   :  { %p694_p9 = pnand %p693_p8, %p687_p5 }
  0x31   :  { %697 = shalt.err (!%p694_p9)
}
  0x32   :  { %42 = dma.hbm_to_vmem [thread:$0]  %s822_s2, 128, %s40_s29, [#allocation6]  }
  0x33   :  { %720 = dma.done.wait [#allocation3], 128  }
  0x34   :  { %721 = vsyncadd [#allocation3], 4294967168 }
  0x35   :  { %722 = dma.done.wait [#allocation6], 4224  }
  0x36   :  { %723 = vsyncadd [#allocation6], 4294963072  ;;  %v731_v0 = vmov 0.0   ;;  %v598_v1 = vld [vmem:[#allocation5 + $0x40] sm:$0xff]   ;;  %v600_v3 = vld [vmem:[#allocation5 + $0x48] sm:$0xff]   ;;  %vm732_vm0 = vmmov 0  }
  0x37   :  { %550 = vmatprep.subr.bf16.mxu1 %v731_v0  ;;  %v599_v2 = vld [vmem:[#allocation5] sm:$0xff]   ;;  %510 = vmatprep.subr.bf16.mxu0 %v598_v1  ;;  %v601_v4 = vld [vmem:[#allocation5 + $0x8] sm:$0xff]   ;;  %v602_v5 = vld [vmem:[#allocation5 + $0x50] sm:$0xff]   ;;  %s733_s2 = smov [#allocation8]  }
  0x38   :  { %511 = vmatpush3.bf16.msra.mxu0 %v599_v2  ;;  %v603_v6 = vld [vmem:[#allocation5 + $0x10] sm:$0xff]   ;;  %v604_v7 = vld [vmem:[#allocation5 + $0x58] sm:$0xff]   ;;  %v606_v9 = vld [vmem:[#allocation5 + $0x60] sm:$0xff]   ;;  %566 = vmatprep.mubr.msk.bf16.mxu1 %vm732_vm0, %v731_v0  ;;  %s463_s21 = sshll.u32 %s733_s2, 4  ;;  %s464_s21 = int_to_ptr.vmem [resolvable:$true] %s463_s21 }
  0x39   :  { %512 = vmatprep.subr.bf16.mxu0 %v600_v3  ;;  %v605_v8 = vld [vmem:[#allocation5 + $0x18] sm:$0xff]   ;;  %v607_v10 = vld [vmem:[#allocation5 + $0x20] sm:$0xff]   ;;  %v608_v11 = vld [vmem:[#allocation5 + $0x68] sm:$0xff]   ;;  %s698_s22 = scalar_lea.vmem %s464_s21, 128  ;;  %p703_p11 = scmp.lt.s32.totalorder %s464_s21, %s464_s21 }
  0x3a   :  { %v53_v12 = vld [vmem:[#allocation2] sm:$0xff]  ;;  %v616_v14 = vld [vmem:[#allocation5 + $0x80] sm:$0xff]   ;;  %v609_v15 = vld [vmem:[#allocation5 + $0x28] sm:$0xff]   ;;  %p699_p10 = scmp.ne.s32.totalorder %s464_s21, %s698_s22  ;;  %p704_p12 = scmp.lt.s32.totalorder %s698_s22, %s698_s22 }
  0x3b   :  { %v475_v13 = vcombine.high %v53_v12, %v53_v12  ;;  %v610_v16 = vld [vmem:[#allocation5 + $0x70] sm:$0xff]   ;;  %551 = vmatpush3.bf16.msra.mxu1 %v616_v14  ;;  %v617_v17 = vld [vmem:[#allocation5 + $0x88] sm:$0xff]   ;;  %v612_v19 = vld [vmem:[#allocation5 + $0x78] sm:$0xff]   ;;  %v474_v23 = vcombine.low %v53_v12, %v53_v12 }
  0x3c   :  { %513 = vmatpush3.bf16.msra.mxu0 %v601_v4  ;;  %v611_v18 = vld [vmem:[#allocation5 + $0x30] sm:$0xff]   ;;  %552 = vmatprep.subr.bf16.mxu1 %v731_v0  ;;  %v613_v21 = vld [vmem:[#allocation5 + $0x38] sm:$0xff]   ;;  %v620_v24 = vld [vmem:[#allocation5 + $0xa0] sm:$0xff]   ;;  %p705_p13 = por %p704_p12, %p703_p11 }
  0x3d   :  { %514 = vmatprep.subr.bf16.mxu0 %v602_v5  ;;  %258 = vmatprep.mubr.bf16.mxu0 %v475_v13  ;;  %v618_v20 = vld [vmem:[#allocation5 + $0x90] sm:$0xff]   ;;  %v619_v22 = vld [vmem:[#allocation5 + $0x98] sm:$0xff]   ;;  %v621_v25 = vld [vmem:[#allocation5 + $0xa8] sm:$0xff]  }
  0x3e   :  { %v622_v26 = vld [vmem:[#allocation5 + $0xb0] sm:$0xff]   ;;  %v623_v27 = vld [vmem:[#allocation5 + $0xb8] sm:$0xff]   ;;  %v624_v28 = vld [vmem:[#allocation5 + $0xc0] sm:$0xff]   ;;  %p706_p0 = pnand %p705_p13, %p699_p10 }
  0x3f   :  { %553 = vmatpush3.bf16.msra.mxu1 %v617_v17  ;;  %v625_v29 = vld [vmem:[#allocation5 + $0xc8] sm:$0xff]   ;;  %v626_v30 = vld [vmem:[#allocation5 + $0xd0] sm:$0xff]   ;;  %v627_v31 = vld [vmem:[#allocation5 + $0xd8] sm:$0xff]  }
  0x40   :  { %515 = vmatpush3.bf16.msra.mxu0 %v603_v6  ;;  %554 = vmatprep.subr.bf16.mxu1 %v731_v0  ;;  %v628_v32 = vld [vmem:[#allocation5 + $0xe0] sm:$0xff]   ;;  %v629_v33 = vld [vmem:[#allocation5 + $0xe8] sm:$0xff]   ;;  %v630_v43 = vld [vmem:[#allocation5 + $0xf0] sm:$0xff]  }
  0x41   :  { %516 = vmatprep.subr.bf16.mxu0 %v604_v7  ;;  %v473_v35 = vld [vmem:[#allocation7] ss:$0 sm:$0xff]  ;;  %v631_v44 = vld [vmem:[#allocation5 + $0xf8] sm:$0xff]   ;;  %v492_v45 = vld [vmem:[#allocation7 + $0x1] ss:$0 sm:$0xff] }
  0x42   :  { %v501_v53 = vld [vmem:[#allocation7 + $0x2] ss:$0 sm:$0xff] }
  0x43   :  { %555 = vmatpush3.bf16.msra.mxu1 %v618_v20 }
  0x44   :  { %517 = vmatpush3.bf16.msra.mxu0 %v605_v8  ;;  %556 = vmatprep.subr.bf16.mxu1 %v731_v0 }
  0x45   :  { %518 = vmatprep.subr.bf16.mxu0 %v606_v9 }
  0x47   :  { %557 = vmatpush3.bf16.msra.mxu1 %v619_v22 }
  0x48   :  { %519 = vmatpush3.bf16.msra.mxu0 %v607_v10  ;;  %558 = vmatprep.subr.bf16.mxu1 %v731_v0 }
  0x49   :  { %520 = vmatprep.subr.bf16.mxu0 %v608_v11 }
  0x4b   :  { %559 = vmatpush3.bf16.msra.mxu1 %v620_v24 }
  0x4c   :  { %521 = vmatpush3.bf16.msra.mxu0 %v609_v15  ;;  %560 = vmatprep.subr.bf16.mxu1 %v731_v0 }
  0x4d   :  { %522 = vmatprep.subr.bf16.mxu0 %v610_v16 }
  0x4f   :  { %561 = vmatpush3.bf16.msra.mxu1 %v621_v25 }
  0x50   :  { %523 = vmatpush3.bf16.msra.mxu0 %v611_v18  ;;  %562 = vmatprep.subr.bf16.mxu1 %v731_v0 }
  0x51   :  { %524 = vmatprep.subr.bf16.mxu0 %v612_v19 }
  0x53   :  { %563 = vmatpush3.bf16.msra.mxu1 %v622_v26 }
  0x54   :  { %525 = vmatpush3.bf16.msra.mxu0 %v613_v21  ;;  %564 = vmatprep.subr.bf16.mxu1 %v731_v0 }
  0x55   :  { %570 = vmatprep.subr.bf16.mxu0 %v731_v0 }
  0x57   :  { %259 = vmatmul.mubr.bf16.vlgmr.msra.gmra.mrb[0].mxu0 %v474_v23  ;;  %565 = vmatpush3.bf16.msra.mxu1 %v623_v27 }
  0x58   :  { %586 = vmatprep.mubr.msk.bf16.mxu0 %vm732_vm0, %v731_v0  ;;  %571 = vmatpush3.bf16.msra.mxu0 %v624_v28 }
  0x59   :  { %572 = vmatprep.subr.bf16.mxu0 %v731_v0 }
  0x5c   :  { %573 = vmatpush3.bf16.msra.mxu0 %v625_v29 }
  0x5d   :  { %574 = vmatprep.subr.bf16.mxu0 %v731_v0 }
  0x60   :  { %575 = vmatpush3.bf16.msra.mxu0 %v626_v30 }
  0x61   :  { %576 = vmatprep.subr.bf16.mxu0 %v731_v0 }
  0x64   :  { %577 = vmatpush3.bf16.msra.mxu0 %v627_v31 }
  0x65   :  { %578 = vmatprep.subr.bf16.mxu0 %v731_v0 }
  0x68   :  { %579 = vmatpush3.bf16.msra.mxu0 %v628_v32 }
  0x69   :  { %580 = vmatprep.subr.bf16.mxu0 %v731_v0 }
  0x6c   :  { %581 = vmatpush3.bf16.msra.mxu0 %v629_v33 }
  0x6d   :  { %582 = vmatprep.subr.bf16.mxu0 %v731_v0 }
  0x70   :  { %583 = vmatpush3.bf16.msra.mxu0 %v630_v43 }
  0x71   :  { %584 = vmatprep.subr.bf16.mxu0 %v731_v0 }
  0x74   :  { %585 = vmatpush3.bf16.msra.mxu0 %v631_v44 }
 0x12a   :  { %v526_v34 = vpop.f32.mrb[0].mxu0 }
 0x12b   :  { %v527_v36 = vpop.f32.mrb[1].mxu0 }
 0x12c   :  { %v528_v37 = vadd.f32 %v527_v36, %v526_v34  ;;  %v529_v38 = vpop.f32.mrb[2].mxu0 }
 0x12d   :  { %v530_v39 = vpop.f32.mrb[3].mxu0 }
 0x12e   :  { %v261_v40 = vadd.f32 %v528_v37, %v473_v35 }
 0x130   :  { %v266_v41 = vmax.f32 %v261_v40, 0.0 }
 0x132   :  { %v267_v42 = vpack.c.bf16 %v266_v41, %v266_v41 }
 0x134   :  { %567 = vmatmul.mubr.bf16.vlgmr.msra.gmra.mrb[0].mxu1 %v267_v42 }
 0x207   :  { %v355_v46 = vpop.f32.mrb[0].mxu1 }
 0x208   :  { %v356_v47 = vadd.f32 %v492_v45, %v355_v46  ;;  %v568_v48 = vpop.f32.mrb[1].mxu1 }
 0x209   :  { %v358_v49 = vpop.f32.mrb[2].mxu1 }
 0x20a   :  { %v361_v50 = vmax.f32 %v356_v47, 0.0  ;;  %v569_v51 = vpop.f32.mrb[3].mxu1 }
 0x20c   :  { %v362_v52 = vpack.c.bf16 %v361_v50, %v361_v50 }
 0x20e   :  { %587 = vmatmul.mubr.bf16.vlgmr.msra.gmra.mrb[4].mxu0 %v362_v52 }
 0x2e1   :  { %v450_v54 = vpop.f32.mrb[4].mxu0 }
 0x2e2   :  { %v451_v55 = vadd.f32 %v501_v53, %v450_v54  ;;  %v588_v56 = vpop.f32.mrb[5].mxu0 }
 0x2e3   :  { %v453_v57 = vpop.f32.mrb[6].mxu0 }
 0x2e4   :  { %456 = vst [vmem:[#allocation8] sm:$0xff] %v451_v55  ;;  %v589_v58 = vpop.f32.mrb[7].mxu0 }
 0x2e5   :  { %709 = shalt.err (!%p706_p0)
}
 0x2e6   :  { %s710_s25 = scalar_lea.hbm %s823_s3, 128 }
 0x2e7   :  { %p711_p1 = scmp.ne.s32.totalorder %s823_s3, %s710_s25  ;;  %p714_p2 = scmp.lt.u32.totalorder %s710_s25, %s823_s3 }
 0x2e9   :  { %p716_p3 = pnand %p714_p2, %p711_p1 }
 0x2eb   :  { %719 = shalt.err (!%p716_p3)
}
 0x2ec   :  { %466 = dma.vmem_to_hbm [thread:$0]  %s464_s21, 128, %s823_s3, [#allocation4]  }
 0x2ed   :  { %724 = dma.done.wait [#allocation4], 128  }
 0x2ee   :  { %725 = vsyncadd [#allocation4], 4294967168 }
 0x2ef   :  { %470 = vsyncpa [#allocation3], 1 }
 0x2f0   :  { %471 = vsyncpa [#allocation6], 1 }
 0x2f1   :  { %472 = vsyncpa [#allocation4], 1 }

</bundles_post_ra>
